<compile_context>
chip_gen: v7x
topology: tpu7x:2x2x1
jax: 0.10.0
libtpu: 0.0.40
codegen_flags: <defaults>
</compile_context>

<pallas_src>
import math

import numpy as np

import jax
import jax.numpy as jnp
from jax import lax
from jax.experimental import pallas as pl
from jax.experimental.pallas import tpu as pltpu  # noqa: F401  (kept for parity)


# ---------------------------------------------------------------------------
# Synthetic CLIP dimensions (the real module uses a pretrained ViT-B/32 CLIP).
# ---------------------------------------------------------------------------
CLIP_RES = 224        # hardcoded in the module (F.interpolate to [224, 224])
PATCH = 32
WIDTH = 32            # transformer width (synthetic small)
EMBED = 32            # CLIP joint embed dim (synthetic small)
CTX_LEN = 8           # context length (synthetic small)
N_PROMPTS = 2         # the module's fallback init creates 2 prompts

CLIP_MEAN = (0.48145466, 0.4578275, 0.40821073)
CLIP_STD = (0.26862954, 0.26130258, 0.27577711)

# synthetic clip.tokenize(' '.join(['X']*16)): SOT, tokens..., EOT(max id).
# Tokenization is data-independent, so the EOT position is a compile-time const.
_TOKENIZED_PROMPTS = np.array([[1., 2., 2., 2., 2., 2., 9., 0.]], np.float32)
EOT_POS = int(_TOKENIZED_PROMPTS[0].argmax())            # -> 6

assert EMBED == WIDTH      # folded image bias is packed as one row of the small slab
assert N_PROMPTS >= 2      # CE target is class index 1 (torch.ones(B).long())


def init_params(key):
    ks = jax.random.split(key, 16)
    patch_dim = 3 * PATCH * PATCH
    nrm = lambda k, shape, scale: (scale * jax.random.normal(k, shape)).astype(jnp.float32)
    return {
        # synthetic image tower
        "patch_proj": nrm(ks[0], (patch_dim, WIDTH), 0.02),
        "image_proj": nrm(ks[1], (WIDTH, EMBED), 0.1),
        # text side (Prompts / TextEncoder)
        "embedding_prompt": nrm(ks[2], (N_PROMPTS, CTX_LEN, WIDTH), 0.1),
        "positional_embedding": nrm(ks[3], (CTX_LEN, WIDTH), 0.01),
        "wq": nrm(ks[4], (WIDTH, WIDTH), 0.1),
        "wk": nrm(ks[5], (WIDTH, WIDTH), 0.1),
        "wv": nrm(ks[6], (WIDTH, WIDTH), 0.1),
        "wo": nrm(ks[7], (WIDTH, WIDTH), 0.1),
        "ln1_g": jnp.ones((WIDTH,), jnp.float32), "ln1_b": jnp.zeros((WIDTH,), jnp.float32),
        "ln2_g": jnp.ones((WIDTH,), jnp.float32), "ln2_b": jnp.zeros((WIDTH,), jnp.float32),
        "w_fc": nrm(ks[8], (WIDTH, 4 * WIDTH), 0.1),
        "w_proj": nrm(ks[9], (4 * WIDTH, WIDTH), 0.1),
        "ln_final_g": jnp.ones((WIDTH,), jnp.float32),
        "ln_final_b": jnp.zeros((WIDTH,), jnp.float32),
        "text_projection": nrm(ks[10], (WIDTH, EMBED), 0.1),
    }


# ---------------------------------------------------------------------------
# One-time parameter packing: fold the entire linear image path, pack text slabs
# ---------------------------------------------------------------------------

def _resize_pool_matrix(in_size):
    """(PATCH, in_size): half-pixel bilinear resize to CLIP_RES (F.interpolate,
    align_corners=False) fused with the mean over the CLIP_RES//PATCH patch
    positions at each intra-patch offset."""
    scale = in_size / CLIP_RES
    r = np.zeros((CLIP_RES, in_size), np.float64)
    for i in range(CLIP_RES):
        s = max((i + 0.5) * scale - 0.5, 0.0)
        i0 = min(int(np.floor(s)), in_size - 1)
        i1 = min(i0 + 1, in_size - 1)
        t = s - i0
        r[i, i0] += 1.0 - t
        r[i, i1] += t
    p = r.reshape(CLIP_RES // PATCH, PATCH, in_size).mean(axis=0)
    return jnp.asarray(p, jnp.float32)


def pack_clip_prompt_params(params, image_hw):
    """Fold preprocessing + image tower into one matrix and pack the text-tower
    operands into two lane-dense slabs.  Call once per parameter update."""
    h_in, w_in = int(image_hw[0]), int(image_hw[1])
    mean_c = jnp.asarray(CLIP_MEAN, jnp.float32)
    std_c = jnp.asarray(CLIP_STD, jnp.float32)
    inv_std_col = jnp.repeat(1.0 / std_c, PATCH * PATCH)        # (3072,) channel-major
    mean_col = jnp.repeat(mean_c, PATCH * PATCH)

    # Image-tower algebra (all linear):
    #   mean_patches(im2col((resize(x)-mean)/std)) @ W1 @ W2  ==  x_flat @ M + b
    w12 = (params["patch_proj"] * inv_std_col[:, None]) @ params["image_proj"]   # (3072, E)
    b_img = -(mean_col * inv_std_col) @ params["patch_proj"] @ params["image_proj"]
    ph = _resize_pool_matrix(h_in)                              # (PATCH, H)
    pw = _resize_pool_matrix(w_in)                              # (PATCH, W)
    m = jnp.einsum("ph,qw,cpqe->chwe", ph, pw, w12.reshape(3, PATCH, PATCH, EMBED))
    # Transposed (EMBED, 3*H*W): long contraction axis lane-dense; bf16 for MXU.
    w_img_t = m.reshape(3 * h_in * w_in, EMBED).T.astype(jnp.bfloat16)

    # Text-tower weight slab: WIDTH rows, lane-dense column-concatenation.
    w_slab = jnp.concatenate(
        [params["wq"], params["wk"], params["wv"],   # qkv    cols [0      : 3W)
         params["wo"],                                # wo     cols [3W     : 4W)
         params["w_fc"],                              # fc     cols [4W     : 8W)
         params["w_proj"].T,                          # proj^T cols [8W     : 12W)
         params["text_projection"]],                  # tproj  cols [12W    : 12W+E)
        axis=1).astype(jnp.float32)

    # Small slab: prompt embeddings (+pos emb), LN params, folded image bias.
    x0 = (params["embedding_prompt"] + params["positional_embedding"][None, :, :]
          ).reshape(N_PROMPTS * CTX_LEN, WIDTH)
    ln = jnp.stack([params["ln1_g"], params["ln1_b"],
                    params["ln2_g"], params["ln2_b"],
                    params["ln_final_g"], params["ln_final_b"]], axis=0)    # (6, W)
    s_slab = jnp.concatenate([x0, ln, b_img[None, :]], axis=0).astype(jnp.float32)

    return {"w_img_t": w_img_t, "w_slab": w_slab, "s_slab": s_slab}


# ---------------------------------------------------------------------------
# Fused Pallas kernel: image features + text transformer + similarity + CE
# ---------------------------------------------------------------------------

def _layernorm(x, g, b, eps=1e-5):
    mu = jnp.mean(x, axis=-1, keepdims=True)
    var = jnp.mean(jnp.square(x - mu), axis=-1, keepdims=True)
    return (x - mu) * lax.rsqrt(var + eps) * g + b


def _clip_prompt_loss_kernel(x_ref, wimg_ref, wslab_ref, sslab_ref, loss_ref):
    w = WIDTH
    nl = N_PROMPTS * CTX_LEN

    sslab = sslab_ref[...]                                  # (NL+7, W) f32
    x0 = sslab[0:nl, :]                                     # prompts + pos emb
    ln = sslab[nl:nl + 6, :]                                # stacked LN params
    b_img = sslab[nl + 6:nl + 7, :]                         # (1, EMBED) folded bias

    # ---- image tower: whole (resize+normalize+patch+pool+proj) folded linear map
    xb = x_ref[...].astype(jnp.bfloat16)                    # (B, 3*H*W)
    feat = lax.dot_general(xb, wimg_ref[...], (((1,), (1,)), ((), ())),
                           preferred_element_type=jnp.float32) + b_img       # (B, E)
    img = feat * lax.rsqrt(jnp.sum(feat * feat, axis=-1, keepdims=True) + 1e-12)

    # ---- text tower: one pre-LN attention + MLP block, per-prompt batched attn
    wslab = wslab_ref[...]                                  # (W, 13W) f32
    wqkv = wslab[:, 0:3 * w]
    wo = wslab[:, 3 * w:4 * w]
    wfc = wslab[:, 4 * w:8 * w]
    wprojt = wslab[:, 8 * w:12 * w]                         # w_proj^T  (W, 4W)
    tproj = wslab[:, 12 * w:12 * w + EMBED]

    h1 = _layernorm(x0, ln[0:1, :], ln[1:2, :])
    qkv = jnp.dot(h1, wqkv, preferred_element_type=jnp.float32)              # (NL, 3W)
    q = qkv[:, 0:w].reshape(N_PROMPTS, CTX_LEN, w)
    k = qkv[:, w:2 * w].reshape(N_PROMPTS, CTX_LEN, w)
    v = qkv[:, 2 * w:3 * w].reshape(N_PROMPTS, CTX_LEN, w)

    # batched per-prompt attention == block-diagonal mask over the NL tokens
    s = jnp.einsum("bqd,bkd->bqk", q, k,
                   preferred_element_type=jnp.float32) * (1.0 / math.sqrt(w))
    s = s - jnp.max(s, axis=-1, keepdims=True)
    p = jnp.exp(s)
    attn = p / jnp.sum(p, axis=-1, keepdims=True)
    ctx = jnp.einsum("bqk,bkd->bqd", attn, v,
                     preferred_element_type=jnp.float32).reshape(nl, w)

    x1 = x0 + jnp.dot(ctx, wo, preferred_element_type=jnp.float32)
    h2 = _layernorm(x1, ln[2:3, :], ln[3:4, :])
    hpre = jnp.dot(h2, wfc, preferred_element_type=jnp.float32)
    hh = hpre * jax.nn.sigmoid(1.702 * hpre)                # CLIP QuickGELU
    x2 = x1 + lax.dot_general(hh, wprojt, (((1,), (1,)), ((), ())),
                              preferred_element_type=jnp.float32)
    xl = _layernorm(x2, ln[4:5, :], ln[5:6, :])

    # EOT select at a static position, text projection, l2 norm
    eot = jnp.concatenate(
        [xl[n * CTX_LEN + EOT_POS:n * CTX_LEN + EOT_POS + 1, :]
         for n in range(N_PROMPTS)], axis=0)                                  # (Np, W)
    txt = jnp.dot(eot, tproj, preferred_element_type=jnp.float32)             # (Np, E)
    txt = txt * lax.rsqrt(jnp.sum(txt * txt, axis=-1, keepdims=True) + 1e-12)

    # ---- Prompts(flag=0): 100 * cosine logits, then CE against class index 1
    logits = 100.0 * lax.dot_general(img, txt, (((1,), (1,)), ((), ())),
                                     preferred_element_type=jnp.float32)      # (B, Np)
    mx = jnp.max(logits, axis=-1, keepdims=True)
    lse = mx + jnp.log(jnp.sum(jnp.exp(logits - mx), axis=-1, keepdims=True))
    per = lse - logits[:, 1:2]                                                # (B, 1)
    b_total = x_ref.shape[0]   # NOTE: must be TOTAL batch if B is ever grid-tiled
    loss_ref[...] = jnp.sum(per, axis=0, keepdims=True) / float(b_total)      # (1, 1)


def l_clip_pretrained_prompt_forward(enhanced, packed, weight=1.0):
    """Forward of L_CLIP_Pretrained_Prompt. enhanced: NCHW float32 in [0, 1]."""
    b = enhanced.shape[0]
    x_flat = enhanced.astype(jnp.float32).reshape(b, -1)      # (B, 3*H*W), free reshape

    # Single fused, single-shot kernel (no grid): all 4 operands are small,
    # full-array resident in VMEM, no pipeline prologue / double buffering.
    # TODO(synk): for very large B, add a "parallel" batch grid axis (v7x megacore)
    #   with a partial-sum accumulator and divide by the TOTAL batch size.
    loss = pl.pallas_call(
        _clip_prompt_loss_kernel,
        out_shape=jax.ShapeDtypeStruct((1, 1), jnp.float32),
    )(x_flat, packed["w_img_t"], packed["w_slab"], packed["s_slab"])
    return weight * loss[0, 0]


if __name__ == "__main__":
    key = jax.random.PRNGKey(0)
    k_img, k_par = jax.random.split(key)
    enhanced = jax.random.uniform(k_img, (2, 3, 16, 16), jnp.float32)  # NCHW, small
    params = init_params(k_par)

    packed = pack_clip_prompt_params(params, enhanced.shape[2:])       # once, not per call
    loss = jax.jit(l_clip_pretrained_prompt_forward)(enhanced, packed)
    jax.block_until_ready(loss)
    assert loss.shape == () and bool(jnp.isfinite(loss))
    print("KERNEL_OK")
</pallas_src>

<mosaic_0001>
module attributes {stable_mosaic.version = 11 : i64} {
  func.func @_clip_prompt_loss_kernel(%arg0: memref<2x768xf32, #tpu.memory_space<vmem>>, %arg1: memref<32x768xbf16, #tpu.memory_space<vmem>>, %arg2: memref<32x416xf32, #tpu.memory_space<vmem>>, %arg3: memref<23x32xf32, #tpu.memory_space<vmem>>, %arg4: memref<1x1xf32, #tpu.memory_space<vmem>>) attributes {dimension_semantics = [], scalar_prefetch = 0 : i64, scratch_operands = 0 : i64, tpu.core_type = #tpu.core_type<tc>} {
    %c0 = arith.constant 0 : index
    %c0_0 = arith.constant 0 : index
    %0 = vector.load %arg3[%c0, %c0_0] : memref<23x32xf32, #tpu.memory_space<vmem>>, vector<23x32xf32>
    %1 = vector.extract_strided_slice %0 {offsets = [0, 0], sizes = [16, 32], strides = [1, 1]} : vector<23x32xf32> to vector<16x32xf32>
    %2 = vector.extract_strided_slice %0 {offsets = [16, 0], sizes = [6, 32], strides = [1, 1]} : vector<23x32xf32> to vector<6x32xf32>
    %3 = vector.extract_strided_slice %0 {offsets = [22, 0], sizes = [1, 32], strides = [1, 1]} : vector<23x32xf32> to vector<1x32xf32>
    %c0_1 = arith.constant 0 : index
    %c0_2 = arith.constant 0 : index
    %4 = vector.load %arg0[%c0_1, %c0_2] : memref<2x768xf32, #tpu.memory_space<vmem>>, vector<2x768xf32>
    %5 = arith.truncf %4 : vector<2x768xf32> to vector<2x768xbf16>
    %c0_3 = arith.constant 0 : index
    %c0_4 = arith.constant 0 : index
    %6 = vector.load %arg1[%c0_3, %c0_4] : memref<32x768xbf16, #tpu.memory_space<vmem>>, vector<32x768xbf16>
    %cst = arith.constant dense<0.000000e+00> : vector<2x32xf32>
    %7 = tpu.matmul %5, %6, %cst {dimension_numbers = #tpu.dot_dimension_numbers<[1], [1], [0], [0], [0, 0, 1, 0], [], []>} : vector<2x768xbf16>, vector<32x768xbf16>, vector<2x32xf32> -> vector<2x32xf32>
    %8 = vector.broadcast %3 : vector<1x32xf32> to vector<2x32xf32>
    %9 = arith.addf %7, %8 : vector<2x32xf32>
    %10 = arith.mulf %9, %9 : vector<2x32xf32>
    %cst_5 = arith.constant dense<0.000000e+00> : vector<2xf32>
    %11 = vector.multi_reduction <add>, %10, %cst_5 [1] : vector<2x32xf32> to vector<2xf32>
    %12 = vector.shape_cast %11 : vector<2xf32> to vector<2x1xf32>
    %cst_6 = arith.constant 9.99999996E-13 : f32
    %13 = vector.broadcast %cst_6 : f32 to vector<2x1xf32>
    %14 = arith.addf %12, %13 : vector<2x1xf32>
    %15 = math.rsqrt %14 : vector<2x1xf32>
    %16 = vector.broadcast %15 : vector<2x1xf32> to vector<2x32xf32>
    %17 = arith.mulf %9, %16 : vector<2x32xf32>
    %c0_7 = arith.constant 0 : index
    %c0_8 = arith.constant 0 : index
    %18 = vector.load %arg2[%c0_7, %c0_8] : memref<32x416xf32, #tpu.memory_space<vmem>>, vector<32x416xf32>
    %19 = vector.extract_strided_slice %18 {offsets = [0, 0], sizes = [32, 96], strides = [1, 1]} : vector<32x416xf32> to vector<32x96xf32>
    %20 = vector.extract_strided_slice %18 {offsets = [0, 96], sizes = [32, 32], strides = [1, 1]} : vector<32x416xf32> to vector<32x32xf32>
    %21 = vector.extract_strided_slice %18 {offsets = [0, 128], sizes = [32, 128], strides = [1, 1]} : vector<32x416xf32> to vector<32x128xf32>
    %22 = vector.extract_strided_slice %18 {offsets = [0, 256], sizes = [32, 128], strides = [1, 1]} : vector<32x416xf32> to vector<32x128xf32>
    %23 = vector.extract_strided_slice %18 {offsets = [0, 384], sizes = [32, 32], strides = [1, 1]} : vector<32x416xf32> to vector<32x32xf32>
    %24 = vector.extract_strided_slice %2 {offsets = [0, 0], sizes = [1, 32], strides = [1, 1]} : vector<6x32xf32> to vector<1x32xf32>
    %25 = vector.extract_strided_slice %2 {offsets = [1, 0], sizes = [1, 32], strides = [1, 1]} : vector<6x32xf32> to vector<1x32xf32>
    %cst_9 = arith.constant dense<0.000000e+00> : vector<16xf32>
    %26 = vector.multi_reduction <add>, %1, %cst_9 [1] : vector<16x32xf32> to vector<16xf32>
    %27 = vector.shape_cast %26 : vector<16xf32> to vector<16x1xf32>
    %cst_10 = arith.constant 3.200000e+01 : f32
    %28 = vector.broadcast %cst_10 : f32 to vector<16x1xf32>
    %29 = arith.divf %27, %28 : vector<16x1xf32>
    %30 = vector.broadcast %29 : vector<16x1xf32> to vector<16x32xf32>
    %31 = arith.subf %1, %30 : vector<16x32xf32>
    %32 = arith.mulf %31, %31 : vector<16x32xf32>
    %cst_11 = arith.constant dense<0.000000e+00> : vector<16xf32>
    %33 = vector.multi_reduction <add>, %32, %cst_11 [1] : vector<16x32xf32> to vector<16xf32>
    %34 = vector.shape_cast %33 : vector<16xf32> to vector<16x1xf32>
    %cst_12 = arith.constant 3.200000e+01 : f32
    %35 = vector.broadcast %cst_12 : f32 to vector<16x1xf32>
    %36 = arith.divf %34, %35 : vector<16x1xf32>
    %37 = vector.broadcast %29 : vector<16x1xf32> to vector<16x32xf32>
    %38 = arith.subf %1, %37 : vector<16x32xf32>
    %cst_13 = arith.constant 9.99999974E-6 : f32
    %39 = vector.broadcast %cst_13 : f32 to vector<16x1xf32>
    %40 = arith.addf %36, %39 : vector<16x1xf32>
    %41 = math.rsqrt %40 : vector<16x1xf32>
    %42 = vector.broadcast %41 : vector<16x1xf32> to vector<16x32xf32>
    %43 = arith.mulf %38, %42 : vector<16x32xf32>
    %44 = vector.broadcast %24 : vector<1x32xf32> to vector<16x32xf32>
    %45 = arith.mulf %43, %44 : vector<16x32xf32>
    %46 = vector.broadcast %25 : vector<1x32xf32> to vector<16x32xf32>
    %47 = arith.addf %45, %46 : vector<16x32xf32>
    %cst_14 = arith.constant dense<0.000000e+00> : vector<16x96xf32>
    %48 = tpu.matmul %47, %19, %cst_14 {dimension_numbers = #tpu.dot_dimension_numbers<[1], [0], [0], [1], [0, 0, 1, 1], [], []>} : vector<16x32xf32>, vector<32x96xf32>, vector<16x96xf32> -> vector<16x96xf32>
    %49 = vector.extract_strided_slice %48 {offsets = [0, 0], sizes = [16, 32], strides = [1, 1]} : vector<16x96xf32> to vector<16x32xf32>
    %50 = vector.shape_cast %49 : vector<16x32xf32> to vector<2x8x32xf32>
    %51 = vector.extract_strided_slice %48 {offsets = [0, 32], sizes = [16, 32], strides = [1, 1]} : vector<16x96xf32> to vector<16x32xf32>
    %52 = vector.shape_cast %51 : vector<16x32xf32> to vector<2x8x32xf32>
    %53 = vector.extract_strided_slice %48 {offsets = [0, 64], sizes = [16, 32], strides = [1, 1]} : vector<16x96xf32> to vector<16x32xf32>
    %54 = vector.shape_cast %53 : vector<16x32xf32> to vector<2x8x32xf32>
    "tpu.trace_start"() <{level = 10 : i32, message = "bqd,bkd->bqk"}> : () -> ()
    %cst_15 = arith.constant dense<0.000000e+00> : vector<2x8x8xf32>
    %55 = tpu.matmul %50, %52, %cst_15 {dimension_numbers = #tpu.dot_dimension_numbers<[2], [2], [1], [1], [0, 0, 0, 1, 1, 1], [0], [0]>} : vector<2x8x32xf32>, vector<2x8x32xf32>, vector<2x8x8xf32> -> vector<2x8x8xf32>
    "tpu.trace_stop"() : () -> ()
    %cst_16 = arith.constant 0.176776692 : f32
    %56 = vector.broadcast %cst_16 : f32 to vector<2x8x8xf32>
    %57 = arith.mulf %55, %56 : vector<2x8x8xf32>
    %cst_17 = arith.constant dense<0xFF800000> : vector<2x8xf32>
    %58 = vector.multi_reduction <maximumf>, %57, %cst_17 [2] : vector<2x8x8xf32> to vector<2x8xf32>
    %59 = vector.shape_cast %58 : vector<2x8xf32> to vector<2x8x1xf32>
    %60 = vector.broadcast %59 : vector<2x8x1xf32> to vector<2x8x8xf32>
    %61 = arith.subf %57, %60 : vector<2x8x8xf32>
    %62 = math.exp %61 : vector<2x8x8xf32>
    %cst_18 = arith.constant dense<0.000000e+00> : vector<2x8xf32>
    %63 = vector.multi_reduction <add>, %62, %cst_18 [2] : vector<2x8x8xf32> to vector<2x8xf32>
    %64 = vector.shape_cast %63 : vector<2x8xf32> to vector<2x8x1xf32>
    %65 = vector.broadcast %64 : vector<2x8x1xf32> to vector<2x8x8xf32>
    %66 = arith.divf %62, %65 : vector<2x8x8xf32>
    "tpu.trace_start"() <{level = 10 : i32, message = "bqk,bkd->bqd"}> : () -> ()
    %cst_19 = arith.constant dense<0.000000e+00> : vector<2x8x32xf32>
    %67 = tpu.matmul %66, %54, %cst_19 {dimension_numbers = #tpu.dot_dimension_numbers<[2], [1], [1], [2], [0, 0, 0, 1, 1, 2], [0], [0]>} : vector<2x8x8xf32>, vector<2x8x32xf32>, vector<2x8x32xf32> -> vector<2x8x32xf32>
    "tpu.trace_stop"() : () -> ()
    %68 = vector.shape_cast %67 : vector<2x8x32xf32> to vector<16x32xf32>
    %cst_20 = arith.constant dense<0.000000e+00> : vector<16x32xf32>
    %69 = tpu.matmul %68, %20, %cst_20 {dimension_numbers = #tpu.dot_dimension_numbers<[1], [0], [0], [1], [0, 0, 1, 1], [], []>} : vector<16x32xf32>, vector<32x32xf32>, vector<16x32xf32> -> vector<16x32xf32>
    %70 = arith.addf %1, %69 : vector<16x32xf32>
    %71 = vector.extract_strided_slice %2 {offsets = [2, 0], sizes = [1, 32], strides = [1, 1]} : vector<6x32xf32> to vector<1x32xf32>
    %72 = vector.extract_strided_slice %2 {offsets = [3, 0], sizes = [1, 32], strides = [1, 1]} : vector<6x32xf32> to vector<1x32xf32>
    %cst_21 = arith.constant dense<0.000000e+00> : vector<16xf32>
    %73 = vector.multi_reduction <add>, %70, %cst_21 [1] : vector<16x32xf32> to vector<16xf32>
    %74 = vector.shape_cast %73 : vector<16xf32> to vector<16x1xf32>
    %cst_22 = arith.constant 3.200000e+01 : f32
    %75 = vector.broadcast %cst_22 : f32 to vector<16x1xf32>
    %76 = arith.divf %74, %75 : vector<16x1xf32>
    %77 = vector.broadcast %76 : vector<16x1xf32> to vector<16x32xf32>
    %78 = arith.subf %70, %77 : vector<16x32xf32>
    %79 = arith.mulf %78, %78 : vector<16x32xf32>
    %cst_23 = arith.constant dense<0.000000e+00> : vector<16xf32>
    %80 = vector.multi_reduction <add>, %79, %cst_23 [1] : vector<16x32xf32> to vector<16xf32>
    %81 = vector.shape_cast %80 : vector<16xf32> to vector<16x1xf32>
    %cst_24 = arith.constant 3.200000e+01 : f32
    %82 = vector.broadcast %cst_24 : f32 to vector<16x1xf32>
    %83 = arith.divf %81, %82 : vector<16x1xf32>
    %84 = vector.broadcast %76 : vector<16x1xf32> to vector<16x32xf32>
    %85 = arith.subf %70, %84 : vector<16x32xf32>
    %cst_25 = arith.constant 9.99999974E-6 : f32
    %86 = vector.broadcast %cst_25 : f32 to vector<16x1xf32>
    %87 = arith.addf %83, %86 : vector<16x1xf32>
    %88 = math.rsqrt %87 : vector<16x1xf32>
    %89 = vector.broadcast %88 : vector<16x1xf32> to vector<16x32xf32>
    %90 = arith.mulf %85, %89 : vector<16x32xf32>
    %91 = vector.broadcast %71 : vector<1x32xf32> to vector<16x32xf32>
    %92 = arith.mulf %90, %91 : vector<16x32xf32>
    %93 = vector.broadcast %72 : vector<1x32xf32> to vector<16x32xf32>
    %94 = arith.addf %92, %93 : vector<16x32xf32>
    %cst_26 = arith.constant dense<0.000000e+00> : vector<16x128xf32>
    %95 = tpu.matmul %94, %21, %cst_26 {dimension_numbers = #tpu.dot_dimension_numbers<[1], [0], [0], [1], [0, 0, 1, 1], [], []>} : vector<16x32xf32>, vector<32x128xf32>, vector<16x128xf32> -> vector<16x128xf32>
    %cst_27 = arith.constant 1.702000e+00 : f32
    %96 = vector.broadcast %cst_27 : f32 to vector<16x128xf32>
    %97 = arith.mulf %96, %95 : vector<16x128xf32>
    %98 = arith.negf %97 : vector<16x128xf32>
    %99 = math.exp %98 : vector<16x128xf32>
    %cst_28 = arith.constant 1.000000e+00 : f32
    %100 = vector.broadcast %cst_28 : f32 to vector<16x128xf32>
    %101 = arith.addf %100, %99 : vector<16x128xf32>
    %102 = arith.divf %100, %101 : vector<16x128xf32>
    %103 = arith.mulf %95, %102 : vector<16x128xf32>
    %cst_29 = arith.constant dense<0.000000e+00> : vector<16x32xf32>
    %104 = tpu.matmul %103, %22, %cst_29 {dimension_numbers = #tpu.dot_dimension_numbers<[1], [1], [0], [0], [0, 0, 1, 0], [], []>} : vector<16x128xf32>, vector<32x128xf32>, vector<16x32xf32> -> vector<16x32xf32>
    %105 = arith.addf %70, %104 : vector<16x32xf32>
    %106 = vector.extract_strided_slice %2 {offsets = [4, 0], sizes = [1, 32], strides = [1, 1]} : vector<6x32xf32> to vector<1x32xf32>
    %107 = vector.extract_strided_slice %2 {offsets = [5, 0], sizes = [1, 32], strides = [1, 1]} : vector<6x32xf32> to vector<1x32xf32>
    %cst_30 = arith.constant dense<0.000000e+00> : vector<16xf32>
    %108 = vector.multi_reduction <add>, %105, %cst_30 [1] : vector<16x32xf32> to vector<16xf32>
    %109 = vector.shape_cast %108 : vector<16xf32> to vector<16x1xf32>
    %cst_31 = arith.constant 3.200000e+01 : f32
    %110 = vector.broadcast %cst_31 : f32 to vector<16x1xf32>
    %111 = arith.divf %109, %110 : vector<16x1xf32>
    %112 = vector.broadcast %111 : vector<16x1xf32> to vector<16x32xf32>
    %113 = arith.subf %105, %112 : vector<16x32xf32>
    %114 = arith.mulf %113, %113 : vector<16x32xf32>
    %cst_32 = arith.constant dense<0.000000e+00> : vector<16xf32>
    %115 = vector.multi_reduction <add>, %114, %cst_32 [1] : vector<16x32xf32> to vector<16xf32>
    %116 = vector.shape_cast %115 : vector<16xf32> to vector<16x1xf32>
    %cst_33 = arith.constant 3.200000e+01 : f32
    %117 = vector.broadcast %cst_33 : f32 to vector<16x1xf32>
    %118 = arith.divf %116, %117 : vector<16x1xf32>
    %119 = vector.broadcast %111 : vector<16x1xf32> to vector<16x32xf32>
    %120 = arith.subf %105, %119 : vector<16x32xf32>
    %cst_34 = arith.constant 9.99999974E-6 : f32
    %121 = vector.broadcast %cst_34 : f32 to vector<16x1xf32>
    %122 = arith.addf %118, %121 : vector<16x1xf32>
    %123 = math.rsqrt %122 : vector<16x1xf32>
    %124 = vector.broadcast %123 : vector<16x1xf32> to vector<16x32xf32>
    %125 = arith.mulf %120, %124 : vector<16x32xf32>
    %126 = vector.broadcast %106 : vector<1x32xf32> to vector<16x32xf32>
    %127 = arith.mulf %125, %126 : vector<16x32xf32>
    %128 = vector.broadcast %107 : vector<1x32xf32> to vector<16x32xf32>
    %129 = arith.addf %127, %128 : vector<16x32xf32>
    %130 = vector.extract_strided_slice %129 {offsets = [6, 0], sizes = [1, 32], strides = [1, 1]} : vector<16x32xf32> to vector<1x32xf32>
    %131 = vector.extract_strided_slice %129 {offsets = [14, 0], sizes = [1, 32], strides = [1, 1]} : vector<16x32xf32> to vector<1x32xf32>
    %132 = tpu.concatenate %130, %131 in 0 : vector<1x32xf32>, vector<1x32xf32> -> vector<2x32xf32>
    %cst_35 = arith.constant dense<0.000000e+00> : vector<2x32xf32>
    %133 = tpu.matmul %132, %23, %cst_35 {dimension_numbers = #tpu.dot_dimension_numbers<[1], [0], [0], [1], [0, 0, 1, 1], [], []>} : vector<2x32xf32>, vector<32x32xf32>, vector<2x32xf32> -> vector<2x32xf32>
    %134 = arith.mulf %133, %133 : vector<2x32xf32>
    %cst_36 = arith.constant dense<0.000000e+00> : vector<2xf32>
    %135 = vector.multi_reduction <add>, %134, %cst_36 [1] : vector<2x32xf32> to vector<2xf32>
    %136 = vector.shape_cast %135 : vector<2xf32> to vector<2x1xf32>
    %cst_37 = arith.constant 9.99999996E-13 : f32
    %137 = vector.broadcast %cst_37 : f32 to vector<2x1xf32>
    %138 = arith.addf %136, %137 : vector<2x1xf32>
    %139 = math.rsqrt %138 : vector<2x1xf32>
    %140 = vector.broadcast %139 : vector<2x1xf32> to vector<2x32xf32>
    %141 = arith.mulf %133, %140 : vector<2x32xf32>
    %cst_38 = arith.constant dense<0.000000e+00> : vector<2x2xf32>
    %142 = tpu.matmul %17, %141, %cst_38 {dimension_numbers = #tpu.dot_dimension_numbers<[1], [1], [0], [0], [0, 0, 1, 0], [], []>} : vector<2x32xf32>, vector<2x32xf32>, vector<2x2xf32> -> vector<2x2xf32>
    %cst_39 = arith.constant 1.000000e+02 : f32
    %143 = vector.broadcast %cst_39 : f32 to vector<2x2xf32>
    %144 = arith.mulf %143, %142 : vector<2x2xf32>
    %cst_40 = arith.constant dense<0xFF800000> : vector<2xf32>
    %145 = vector.multi_reduction <maximumf>, %144, %cst_40 [1] : vector<2x2xf32> to vector<2xf32>
    %146 = vector.shape_cast %145 : vector<2xf32> to vector<2x1xf32>
    %147 = vector.broadcast %146 : vector<2x1xf32> to vector<2x2xf32>
    %148 = arith.subf %144, %147 : vector<2x2xf32>
    %149 = math.exp %148 : vector<2x2xf32>
    %cst_41 = arith.constant dense<0.000000e+00> : vector<2xf32>
    %150 = vector.multi_reduction <add>, %149, %cst_41 [1] : vector<2x2xf32> to vector<2xf32>
    %151 = vector.shape_cast %150 : vector<2xf32> to vector<2x1xf32>
    %152 = math.log %151 : vector<2x1xf32>
    %153 = arith.addf %146, %152 : vector<2x1xf32>
    %154 = vector.extract_strided_slice %144 {offsets = [0, 1], sizes = [2, 1], strides = [1, 1]} : vector<2x2xf32> to vector<2x1xf32>
    %155 = arith.subf %153, %154 : vector<2x1xf32>
    %cst_42 = arith.constant dense<0.000000e+00> : vector<1xf32>
    %156 = vector.multi_reduction <add>, %155, %cst_42 [0] : vector<2x1xf32> to vector<1xf32>
    %157 = vector.shape_cast %156 : vector<1xf32> to vector<1x1xf32>
    %cst_43 = arith.constant 2.000000e+00 : f32
    %158 = vector.broadcast %cst_43 : f32 to vector<1x1xf32>
    %159 = arith.divf %157, %158 : vector<1x1xf32>
    %c0_44 = arith.constant 0 : index
    %c0_45 = arith.constant 0 : index
    %160 = vector.load %arg4[%c0_44, %c0_45] : memref<1x1xf32, #tpu.memory_space<vmem>>, vector<1x1xf32>
    tpu.vector_store %arg4[%c0_44, %c0_45], %159 {strides = array<i32>} : memref<1x1xf32, #tpu.memory_space<vmem>>, vector<1x1xf32>,
    return
  }
}

</mosaic_0001>

<bundles_post_ra>
// kernel: l_clip_pretrained_prompt_forward.1
= control target key start
LH: loop header
LB: loop body
LE: loop exit
PB: predicated region body
PF: predicated region fallthrough
CT: control target
= control target key end

     0   :  { %9 = vsyncpa [#allocation3], 0  ;;  %s1895_s0 = inlined_call_operand.vmem [shape: f32[2,768], index: 0, kind: input, shape index: {}]   ;;  %s1896_s1 = inlined_call_operand.vmem [shape: bf16[32,768], index: 1, kind: input, shape index: {}]   ;;  %s1897_s2 = inlined_call_operand.hbm [shape: f32[32,416], index: 2, kind: input, shape index: {}]   ;;  %s1898_s3 = inlined_call_operand.hbm [shape: f32[23,32], index: 3, kind: input, shape index: {}]   ;;  %s1899_s4 = inlined_call_operand.hbm [shape: f32[1,1], index: 4, kind: output, shape index: {}]  }
   0x1   :  { %10 = vsyncpa [#allocation6], 0 }
   0x2   :  { %11 = vsyncpa [#allocation4], 0  ;;  %s1670_s15 = smov [#allocation2]   ;;  %s1598_s19 = scalar_lea.hbm %s1897_s2, 2048 }
   0x3   :  { %s21_s16 = sshll.u32 %s1670_s15, 4  ;;  %p1599_p0 = scmp.ne.s32.totalorder %s1897_s2, %s1598_s19  ;;  %s22_s16 = int_to_ptr.vmem [resolvable:$true] %s21_s16 }
   0x4   :  { %p1602_p1 = scmp.lt.u32.totalorder %s1598_s19, %s1897_s2 }
   0x6   :  { %p1604_p2 = pnand %p1602_p1, %p1599_p0 }
   0x8   :  { %1607 = shalt.err (!%p1604_p2)
}
   0x9   :  { %s1608_s24 = scalar_lea.vmem %s22_s16, 2048  ;;  %p1613_p4 = scmp.lt.s32.totalorder %s22_s16, %s22_s16 }
   0xa   :  { %p1609_p3 = scmp.ne.s32.totalorder %s22_s16, %s1608_s24  ;;  %p1614_p5 = scmp.lt.s32.totalorder %s1608_s24, %s1608_s24 }
   0xc   :  { %p1615_p6 = por %p1614_p5, %p1613_p4 }
   0xe   :  { %p1616_p7 = pnand %p1615_p6, %p1609_p3 }
  0x10   :  { %1619 = shalt.err (!%p1616_p7)
}
  0x11   :  { %s1671_s25 = smov 512   ;;  %s1672_s26 = smov 32  }
  0x12   :  { %27 = dma.hbm_to_vmem [thread:$0]  %s1897_s2, 2048, %s22_s16, [#allocation3], %s1671_s25, %s1671_s25, %s1672_s26  }
  0x13   :  { %s1673_s29 = smov [#allocation5]   ;;  %s1620_s7 = scalar_lea.hbm %s1898_s3, 384 }
  0x14   :  { %s33_s30 = sshll.u32 %s1673_s29, 4  ;;  %p1621_p8 = scmp.ne.s32.totalorder %s1898_s3, %s1620_s7  ;;  %s34_s30 = int_to_ptr.vmem [resolvable:$true] %s33_s30 }
  0x15   :  { %p1624_p9 = scmp.lt.u32.totalorder %s1620_s7, %s1898_s3 }
  0x17   :  { %p1626_p10 = pnand %p1624_p9, %p1621_p8 }
  0x19   :  { %1629 = shalt.err (!%p1626_p10)
}
  0x1a   :  { %s1630_s12 = scalar_lea.vmem %s34_s30, 384  ;;  %p1635_p12 = scmp.lt.s32.totalorder %s34_s30, %s34_s30 }
  0x1b   :  { %p1631_p11 = scmp.ne.s32.totalorder %s34_s30, %s1630_s12  ;;  %p1636_p13 = scmp.lt.s32.totalorder %s1630_s12, %s1630_s12 }
  0x1d   :  { %p1637_p0 = por %p1636_p13, %p1635_p12 }
  0x1f   :  { %p1638_p1 = pnand %p1637_p0, %p1631_p11 }
  0x21   :  { %1641 = shalt.err (!%p1638_p1)
}
  0x22   :  { %s1674_s2 = smov 128   ;;  %s1675_s13 = smov 8  }
  0x23   :  { %39 = dma.hbm_to_vmem [thread:$0]  %s1898_s3, 384, %s34_s30, [#allocation6], %s1674_s2, %s1674_s2, %s1675_s13  }
  0x24   :  { %1664 = dma.done.wait [#allocation3], 2048  }
  0x25   :  { %1665 = vsyncadd [#allocation3], 4294965248 }
  0x26   :  { %1666 = dma.done.wait [#allocation6], 384  }
  0x27   :  { %1667 = vsyncadd [#allocation6], 4294966912  ;;  %vm311_vm0 = vcmask 261120   ;;  %v1734_v0 = vld [vmem:[#allocation5] sm:$0xff]  ;;  %v1736_v1 = vld [vmem:[#allocation5 + $0x8] sm:$0xff]  ;;  %v58_v22 = vlaneseq  ;;  %v1676_v41 = vmov 0.0  }
  0x28   :  { %v312_v2 = vsel %vm311_vm0, %v1734_v0, 0.0  ;;  %v315_v3 = vsel %vm311_vm0, %v1736_v1, 0.0  ;;  %v1746_v14 = vld [vmem:[#allocation2] sm:$0xff]  ;;  %v1761_v29 = vld [vmem:[#allocation5 + $0x10] sm:$0x7f]  ;;  %vm1677_vm1 = vmmov 0  }
  0x29   :  { %313 = vadd.xlane.f32.xlu0 %v312_v2  ;;  %v1748_v15 = vld [vmem:[#allocation2 + $0x20] sm:$0xff]  ;;  %v1758_v26 = vshrl.u32 %v58_v22, 7  ;;  %s1678_s3 = smov 96   ;;  %vm588_vm2 = vcmask 64512   ;;  %s1679_s16 = smov 64   ;;  %vm288_vm3 = vcmask 254976  }
  0x2a   :  { %v1750_v16 = vld [vmem:[#allocation2 + $0x40] sm:$0xff]  ;;  %v1472_v17 = vpack.c.bf16 %v1748_v15, %v1746_v14  ;;  %v1533_v2 = vpack.i.bf16 %v1748_v15, %v1746_v14  ;;  %vm1118_vm4 = vcmask 1040384   ;;  %vm1277_vm5 = vcmask 9216  }
  0x2b   :  { %v1754_v18 = vld [vmem:[#allocation2 + $0x60] sm:$0xff]  ;;  %v341_v28 = vsub.s32 0, %v1758_v26  ;;  %v347_v30 = vsub.s32 1, %v1758_v26  ;;  %vm1291_vm6 = vcmask 9224   ;;  %vm1305_vm7 = vcmask 0  }
  0x2c   :  { %v1476_v19 = vpack.c.bf16 %v1754_v18, %v1750_v16  ;;  %1473 = vmatprep.subr.bf16.mxu1 %v1472_v17 }
  0x2d   :  { %316 = vadd.xlane.f32.xlu0 %v315_v3  ;;  %1475 = vmatpush3.bf16.msra.mxu1 %v1472_v17  ;;  %v342_v31 = vrot.slane %v1761_v29, %v341_v28  ;;  %v348_v34 = vrot.slane %v1761_v29, %v347_v30  ;;  %v1538_v3 = vpack.i.bf16 %v1754_v18, %v1750_v16 }
  0x2e   :  { %1477 = vmatprep.subr.bf16.mxu1 %v1476_v19 }
  0x31   :  { %1479 = vmatpush3.bf16.msra.mxu1 %v1476_v19 }
  0x32   :  { %1403 = vmatprep.subr.mxu1 %v1676_v41 }
  0xb6   :  { %v314_v4 = vpop.xlane.xlu0 %313 }
  0xb7   :  { %v319_v5 = vmul.f32 0.03125, %v314_v4 }
  0xb9   :  { %v321_v6 = vsub.f32 %v1734_v0, %v319_v5 }
  0xba   :  { %v317_v7 = vpop.xlane.xlu0 %316 }
  0xbb   :  { %v320_v8 = vmul.f32 0.03125, %v317_v7  ;;  %v323_v9 = vmul.f32 %v321_v6, %v321_v6 }
  0xbd   :  { %v322_v10 = vsub.f32 %v1736_v1, %v320_v8  ;;  %v325_v11 = vsel %vm311_vm0, %v323_v9, 0.0 }
  0xbe   :  { %326 = vadd.xlane.f32.xlu1 %v325_v11 }
  0xbf   :  { %v324_v12 = vmul.f32 %v322_v10, %v322_v10 }
  0xc1   :  { %v328_v13 = vsel %vm311_vm0, %v324_v12, 0.0 }
  0xc2   :  { %329 = vadd.xlane.f32.xlu1 %v328_v13 }
 0x14b   :  { %v327_v20 = vpop.xlane.xlu1 %326 }
 0x14c   :  { %v331_v21 = vmul.f32 0.03125, %v327_v20 }
 0x14e   :  { %v333_v23 = vadd.f32 1e-05, %v331_v21 }
 0x14f   :  { %v330_v24 = vpop.xlane.xlu1 %329 }
 0x150   :  { %1562 = vrsqrt.f32 %v333_v23  ;;  %v332_v25 = vmul.f32 0.03125, %v330_v24 }
 0x152   :  { %v334_v27 = vadd.f32 1e-05, %v332_v25 }
 0x154   :  { %1564 = vrsqrt.f32 %v334_v27 }
 0x15a   :  { %v1563_v32 = vpop.eup %1562 }
 0x15b   :  { %v337_v33 = vmul.f32 %v1563_v32, %v321_v6 }
 0x15d   :  { %v343_v35 = vmul.f32 %v342_v31, %v337_v33 }
 0x15e   :  { %v1565_v36 = vpop.eup %1564 }
 0x15f   :  { %v338_v37 = vmul.f32 %v1565_v36, %v322_v10  ;;  %v349_v38 = vadd.f32 %v348_v34, %v343_v35 }
 0x161   :  { %v344_v39 = vmul.f32 %v342_v31, %v338_v37  ;;  %1400 = vmatprep.mubr.msk.f32.mxu1 %vm311_vm0, %v349_v38 }
 0x163   :  { %v350_v40 = vadd.f32 %v348_v34, %v344_v39 }
 0x165   :  { %1401 = vmatmul.mubr.msk.f32.vlgmr.msra.gmra.mrb[0].mxu1 %vm311_vm0, %v350_v40  ;;  %v296_v40 = vld [vmem:[#allocation2 + $0x8] sm:$0xff] }
 0x166   :  { %1405 = vmatprep.mubr.msk.f32.mxu1 %vm1677_vm1, %v1676_v41 }
 0x238   :  { %v1402_v42 = vpop.f32.mrb[0].mxu1 }
 0x239   :  { %510 = vrot.lane.b32.xlu1 %v1402_v42, %s1678_s3  ;;  %v423_v43 = vpop.f32.mrb[1].mxu1 }
 0x23a   :  { %433 = vrot.lane.b32.xlu0 %v423_v43, %s1678_s3 }
 0x2ab   :  { %v511_v45 = vpop.permute.xlu1 %510 }
 0x2ac   :  { %v434_v44 = vpop.permute.xlu0 %433 }
 0x2ad   :  { %1404 = vmatpush3.xpose.msk.msra.mxu1 %vm311_vm0, %v434_v44  ;;  %v304_v44 = vld [vmem:[#allocation2 + $0x48] sm:$0xff] }
 0x2ae   :  { %1408 = vmatprep.subr.mxu1 %v1676_v41 }
 0x2b0   :  { %1406 = vmatmul.mubr.msk.f32.vlgmr.msra.gmra.mrb[2].mxu1 %vm311_vm0, %v423_v43 }
 0x2b1   :  { %1409 = vmatpush3.xpose.msk.msra.mxu1 %vm311_vm0, %v511_v45  ;;  %1410 = vmatprep.mubr.msk.f32.mxu1 %vm1677_vm1, %v1676_v41  ;;  %v308_v45 = vld [vmem:[#allocation2 + $0x68] sm:$0xff] }
 0x2b2   :  { %1413 = vmatprep.subr.mxu1 %v1676_v41 }
 0x2b4   :  { %1411 = vmatmul.mubr.msk.f32.vlgmr.msra.gmra.mrb[4].mxu1 %vm311_vm0, %v1402_v42 }
 0x2b5   :  { %1415 = vmatprep.mubr.msk.f32.mxu1 %vm1677_vm1, %v1676_v41 }
 0x383   :  { %v505_v46 = vpop.f32.mrb[2].mxu1 }
 0x384   :  { %v586_v47 = vmul.f32 0.17677669, %v505_v46  ;;  %v1407_v48 = vpop.f32.mrb[3].mxu1  ;;  %v1492_v46 = vpack.c.bf16 %v308_v45, %v304_v44  ;;  %v1555_v45 = vld [vmem:[%s1896_s1 + $0x3c] ss:$24 sps:$4 sm:$0xff]  }
 0x386   :  { %v589_v49 = vsel %vm588_vm2, %v586_v47, -inf }
 0x387   :  { %590 = vmax.xlane.f32.xlu1 %v589_v49  ;;  %v582_v50 = vpop.f32.mrb[4].mxu1 }
 0x388   :  { %v587_v51 = vmul.f32 0.17677669, %v582_v50  ;;  %v1412_v52 = vpop.f32.mrb[5].mxu1 }
 0x38a   :  { %v592_v53 = vsel %vm588_vm2, %v587_v51, -inf }
 0x38b   :  { %593 = vmax.xlane.f32.xlu0 %v592_v53  ;;  %v890_v53 = vsub.s32 2, %v1758_v26 }
 0x414   :  { %v591_v54 = vpop.xlane.xlu1 %590 }
 0x415   :  { %v595_v55 = vsub.f32 %v586_v47, %v591_v54  ;;  %v896_v54 = vsub.s32 3, %v1758_v26 }
 0x417   :  { %v597_v56 = vmul.f32 1.442695, %v595_v55  ;;  %v891_v55 = vrot.slane %v1761_v29, %v890_v53  ;;  %v1561_v53 = vld [vmem:[%s1896_s1 + $0x44] ss:$24 sps:$4 sm:$0xff]  }
 0x418   :  { %v594_v57 = vpop.xlane.xlu0 %593 }
 0x419   :  { %1566 = vpow2.f32 %v597_v56  ;;  %v596_v58 = vsub.f32 %v587_v51, %v594_v57 }
 0x41b   :  { %v599_v59 = vmul.f32 1.442695, %v596_v58  ;;  %v897_v58 = vrot.slane %v1761_v29, %v896_v54  ;;  %v1559_v54 = vld [vmem:[%s1896_s1 + $0x40] ss:$24 sps:$4 sm:$0xff]  }
 0x41d   :  { %1568 = vpow2.f32 %v599_v59 }
 0x423   :  { %v1567_v60 = vpop.eup %1566 }
 0x424   :  { %v601_v61 = vsel %vm588_vm2, %v1567_v60, 0.0 }
 0x425   :  { %602 = vadd.xlane.f32.xlu0 %v601_v61 }
 0x427   :  { %v1569_v62 = vpop.eup %1568 }
 0x428   :  { %v604_v63 = vsel %vm588_vm2, %v1569_v62, 0.0 }
 0x429   :  { %605 = vadd.xlane.f32.xlu1 %v604_v63 }
 0x43a   :  { %687 = vrot.lane.b32.xlu1 %v1402_v42, %s1679_s16  ;;  %v300_v42 = vld [vmem:[#allocation2 + $0x28] sm:$0xff] }
 0x43b   :  { %611 = vrot.lane.b32.xlu0 %v423_v43, %s1679_s16  ;;  %v1488_v43 = vpack.c.bf16 %v300_v42, %v296_v40 }
 0x43e   :  { %1534 = vrot.lane.b32.xlu1 %v1533_v2, %s1672_s26 }
 0x442   :  { %1539 = vrot.lane.b32.xlu1 %v1538_v3, %s1672_s26  ;;  %v297_v3 = vld [vmem:[#allocation2 + $0x10] sm:$0xff] }
 0x4b2   :  { %v603_v4 = vpop.xlane.xlu0 %602 }
 0x4b3   :  { %1570 = vrcp.f32 %v603_v4  ;;  %v301_v4 = vld [vmem:[#allocation2 + $0x30] sm:$0xff] }
 0x4b6   :  { %v606_v5 = vpop.xlane.xlu1 %605  ;;  %v612_v6 = vpop.permute.xlu0 %611 }
 0x4b7   :  { %1572 = vrcp.f32 %v606_v5  ;;  %1414 = vmatpush3.msra.mxu1 %v612_v6  ;;  %v1496_v5 = vpack.c.bf16 %v301_v4, %v297_v3  ;;  %v305_v6 = vld [vmem:[#allocation2 + $0x50] sm:$0xff] }
 0x4b8   :  { %1418 = vmatprep.subr.mxu1 %v1676_v41 }
 0x4ba   :  { %v688_v7 = vpop.permute.xlu1 %687 }
 0x4bd   :  { %v1571_v8 = vpop.eup %1570 }
 0x4be   :  { %v608_v9 = vmul.f32 %v1571_v8, %v1567_v60  ;;  %v1535_v10 = vpop.permute.xlu1 %1534 }
 0x4bf   :  { %v1537_v11 = vunpack.i.h.bf16 %v1535_v10  ;;  %v1536_v12 = vunpack.i.l.bf16 %v1535_v10 }
 0x4c0   :  { %1416 = vmatmul.mubr.msk.f32.vlgmr.msra.gmra.mrb[6].mxu1 %vm588_vm2, %v608_v9 }
 0x4c1   :  { %v1573_v13 = vpop.eup %1572  ;;  %1419 = vmatpush3.msra.mxu1 %v688_v7  ;;  %1420 = vmatprep.mubr.msk.f32.mxu1 %vm1677_vm1, %v1676_v41  ;;  %v1480_v14 = vpack.c.bf16 %v1537_v11, %v1536_v12  ;;  %v309_v7 = vld [vmem:[#allocation2 + $0x70] sm:$0xff] }
 0x4c2   :  { %v610_v15 = vmul.f32 %v1573_v13, %v1569_v62  ;;  %v1540_v16 = vpop.permute.xlu1 %1539  ;;  %v1500_v8 = vpack.c.bf16 %v309_v7, %v305_v6 }
 0x4c3   :  { %v1542_v17 = vunpack.i.h.bf16 %v1540_v16  ;;  %v1541_v18 = vunpack.i.l.bf16 %v1540_v16  ;;  %1481 = vmatprep.subr.bf16.mxu1 %v1480_v14 }
 0x4c4   :  { %1421 = vmatmul.mubr.msk.f32.vlgmr.msra.gmra.mrb[8].mxu1 %vm588_vm2, %v610_v15 }
 0x4c5   :  { %v1484_v19 = vpack.c.bf16 %v1542_v17, %v1541_v18  ;;  %1483 = vmatpush3.bf16.msra.mxu1 %v1480_v14 }
 0x4c7   :  { %1485 = vmatprep.subr.bf16.mxu1 %v1484_v19 }
 0x4c9   :  { %1487 = vmatpush3.bf16.msra.mxu1 %v1484_v19 }
 0x4ca   :  { %1489 = vmatprep.subr.bf16.mxu1 %v1488_v43 }
 0x593   :  { %v683_v20 = vpop.f32.mrb[6].mxu1 }
 0x594   :  { %v1417_v21 = vpop.f32.mrb[7].mxu1  ;;  %1431 = vmatprep.mubr.msk.f32.mxu1 %vm311_vm0, %v683_v20 }
 0x597   :  { %v759_v22 = vpop.f32.mrb[8].mxu1 }
 0x598   :  { %v1422_v23 = vpop.f32.mrb[9].mxu1  ;;  %1432 = vmatmul.mubr.msk.f32.vlgmr.msra.gmra.mrb[10].mxu1 %vm311_vm0, %v759_v22 }
 0x599   :  { %1491 = vmatpush3.bf16.msra.mxu1 %v1488_v43  ;;  %v1543_v23 = vld [vmem:[%s1896_s1 + $0x4] ss:$24 sps:$4 sm:$0xff]   ;;  %v1550_v43 = vld [vmem:[%s1896_s1 + $0x8] ss:$24 sps:$4 sm:$0xff]  }
 0x59a   :  { %1493 = vmatprep.subr.bf16.mxu1 %v1492_v46  ;;  %167 = vmatprep.subr.bf16.mxu0 %v1543_v23 }
 0x59d   :  { %1495 = vmatpush3.bf16.msra.mxu1 %v1492_v46  ;;  %v1553_v46 = vld [vmem:[%s1896_s1 + $0x38] ss:$24 sps:$4 sm:$0xff]  }
 0x59e   :  { %1497 = vmatprep.subr.bf16.mxu1 %v1496_v5 }
 0x66b   :  { %v1433_v24 = vpop.f32.mrb[10].mxu1 }
 0x66c   :  { %v1799_v25 = vadd.f32 %v1433_v24, %v1736_v1  ;;  %v851_v27 = vpop.f32.mrb[11].mxu1  ;;  %v1545_v24 = vld [vmem:[%s1896_s1] ss:$24 sps:$4 sm:$0xff]  }
 0x66d   :  { %v1802_v28 = vadd.f32 %v851_v27, %v1734_v0  ;;  %v1546_v27 = vld [vmem:[%s1896_s1 + $0x34] ss:$24 sps:$4 sm:$0xff]   ;;  %168 = vmatpush1.bf16.xpose.msra.mxu0 %v1545_v24 }
 0x66e   :  { %v865_v30 = vsel %vm311_vm0, %v1799_v25, 0.0  ;;  %169 = vmatprep.subr.bf16.mxu0 %v1546_v27 }
 0x66f   :  { %866 = vadd.xlane.f32.xlu1 %v865_v30  ;;  %v862_v31 = vsel %vm311_vm0, %v1802_v28, 0.0  ;;  %v1680_v30 = vmov 1983009808  }
 0x670   :  { %863 = vadd.xlane.f32.xlu0 %v862_v31  ;;  %v56_v31 = vunpack.c.l.s4 %v1680_v30 }
 0x6fc   :  { %v867_v32 = vpop.xlane.xlu1 %866 }
 0x6fd   :  { %v869_v33 = vmul.f32 0.03125, %v867_v32  ;;  %v864_v34 = vpop.xlane.xlu0 %863  ;;  %v50_v32 = vld [vmem:[%s1895_s0] sm:$0xff] }
 0x6fe   :  { %v868_v35 = vmul.f32 0.03125, %v864_v34  ;;  %v57_v34 = vunpack.c.0.s8 %v56_v31 }
 0x6ff   :  { %v871_v36 = vsub.f32 %v1799_v25, %v869_v33  ;;  %v54_v33 = vcombine.high %v50_v32, %v50_v32 }
 0x700   :  { %v870_v1 = vsub.f32 %v1802_v28, %v868_v35  ;;  %v60_v35 = vsub.s32 %v57_v34, %v1758_v26  ;;  %v1102_v34 = vsub.s32 4, %v1758_v26 }
 0x701   :  { %v873_v38 = vmul.f32 %v871_v36, %v871_v36 }
 0x702   :  { %v872_v37 = vmul.f32 %v870_v1, %v870_v1 }
 0x703   :  { %v877_v39 = vsel %vm311_vm0, %v873_v38, 0.0 }
 0x704   :  { %v874_v0 = vsel %vm311_vm0, %v872_v37, 0.0  ;;  %v1552_v37 = vld [vmem:[%s1896_s1 + $0xc] ss:$24 sps:$4 sm:$0xff]  }
 0x705   :  { %875 = vadd.xlane.f32.xlu0 %v874_v0  ;;  %v68_v0 = vrot.slane %v54_v33, %v60_v35 }
 0x709   :  { %878 = vadd.xlane.f32.xlu0 %v877_v39  ;;  %v70_v39 = vcombine.high %v68_v0, %v68_v0 }
 0x70b   :  { %v88_v44 = vpack.c.bf16 %v70_v39, %v70_v39 }
 0x792   :  { %v876_v47 = vpop.xlane.xlu0 %875 }
 0x793   :  { %v880_v48 = vmul.f32 0.03125, %v876_v47  ;;  %v1558_v47 = vld [vmem:[%s1896_s1 + $0x14] ss:$24 sps:$4 sm:$0xff]  }
 0x795   :  { %v882_v49 = vadd.f32 1e-05, %v880_v48  ;;  %v1323_v48 = vld.sshfl [vmem:[%s1895_s0 + $0x8] sm:$0x33 pattern:$0x76325410] }
 0x796   :  { %v879_v50 = vpop.xlane.xlu0 %878  ;;  %s1682_s0 = smov 127  }
 0x797   :  { %1574 = vrsqrt.f32 %v882_v49  ;;  %v881_v51 = vmul.f32 0.03125, %v879_v50  ;;  %v78_v49 = vcombine.high %v1323_v48, %v1323_v48  ;;  %v87_v50 = vpack.c.bf16 %v68_v0, %v68_v0 }
 0x799   :  { %v883_v52 = vadd.f32 1e-05, %v881_v51  ;;  %v1556_v51 = vld [vmem:[%s1896_s1 + $0x10] ss:$24 sps:$4 sm:$0xff]  }
 0x79b   :  { %1576 = vrsqrt.f32 %v883_v52  ;;  %v90_v52 = vpack.c.bf16 %v78_v49, %v78_v49 }
 0x7a1   :  { %v1575_v56 = vpop.eup %1574 }
 0x7a2   :  { %v886_v57 = vmul.f32 %v1575_v56, %v870_v1  ;;  %v61_v1 = vrot.slane %v50_v32, %v60_v35  ;;  %v1108_v35 = vsub.s32 5, %v1758_v26 }
 0x7a4   :  { %v892_v59 = vmul.f32 %v891_v55, %v886_v57  ;;  %v69_v38 = vcombine.high %v61_v1, %v61_v1  ;;  %v85_v42 = vpack.c.bf16 %v61_v1, %v61_v1 }
 0x7a5   :  { %v1577_v60 = vpop.eup %1576 }
 0x7a6   :  { %v887_v61 = vmul.f32 %v1577_v60, %v871_v36  ;;  %v898_v62 = vadd.f32 %v897_v58, %v892_v59  ;;  %v1548_v36 = vld [vmem:[%s1896_s1 + $0x30] ss:$24 sps:$4 sm:$0xff]   ;;  %v86_v40 = vpack.c.bf16 %v69_v38, %v69_v38  ;;  %v1109_v38 = vrot.slane %v1761_v29, %v1108_v35  ;;  %s1683_s1 = smov [#allocation7]  }
 0x7a7   :  { %170 = vmatpush1.bf16.xpose.msra.mxu0 %v1548_v36  ;;  %v1103_v36 = vrot.slane %v1761_v29, %v1102_v34  ;;  %s1313_s17 = sshll.u32 %s1683_s1, 4  ;;  %s1314_s17 = int_to_ptr.vmem [resolvable:$true] %s1313_s17 }
 0x7a8   :  { %v893_v63 = vmul.f32 %v891_v55, %v887_v61  ;;  %1442 = vmatprep.mubr.msk.f32.mxu1 %vm311_vm0, %v898_v62  ;;  %207 = vmatprep.subr.bf16.mxu0 %v1552_v37  ;;  %v89_v55 = vpack.c.bf16 %v1323_v48, %v1323_v48  ;;  %s1642_s18 = scalar_lea.vmem %s1314_s17, 16  ;;  %s1646_s19 = scalar_lea.vmem %s1314_s17, 32 }
 0x7a9   :  { %199 = vmatprep.mubr.bf16.mxu0 %v86_v40  ;;  %p1643_p2 = scmp.ne.s32.totalorder %s1314_s17, %s1642_s18  ;;  %p1647_p3 = scmp.lt.s32.totalorder %s1314_s17, %s1314_s17 }
 0x7aa   :  { %v899_v2 = vadd.f32 %v897_v58, %v893_v63  ;;  %p1648_p4 = scmp.lt.s32.totalorder %s1646_s19, %s1642_s18 }
 0x7ac   :  { %1443 = vmatmul.mubr.msk.f32.vlgmr.msra.gmra.mrb[12].mxu1 %vm311_vm0, %v899_v2  ;;  %p1649_p5 = por %p1648_p4, %p1647_p3 }
 0x7ad   :  { %1499 = vmatpush3.bf16.xpose.msra.mxu1 %v1496_v5 }
 0x7ae   :  { %1501 = vmatprep.subr.bf16.mxu1 %v1500_v8  ;;  %200 = vmatmul.mubr.bf16.vlgmr.msra.gmra.mrb[0].mxu0 %v85_v42  ;;  %p1650_p6 = pnand %p1649_p5, %p1643_p2 }
 0x7af   :  { %208 = vmatpush1.bf16.xpose.msra.mxu0 %v1550_v43  ;;  %239 = vmatprep.mubr.bf16.mxu0 %v88_v44 }
 0x7b0   :  { %209 = vmatprep.subr.bf16.mxu0 %v1555_v45 }
 0x7b5   :  { %1503 = vmatpush3.bf16.xpose.msra.mxu1 %v1500_v8 }
 0x7b7   :  { %210 = vmatpush1.bf16.xpose.msra.mxu0 %v1553_v46 }
 0x7b8   :  { %247 = vmatprep.subr.bf16.mxu0 %v1558_v47 }
 0x7be   :  { %240 = vmatmul.mubr.bf16.vlgmr.msra.gmra.mrb[0].mxu0 %v87_v50 }
 0x7bf   :  { %248 = vmatpush1.bf16.xpose.msra.mxu0 %v1556_v51  ;;  %279 = vmatprep.mubr.bf16.mxu0 %v90_v52 }
 0x7c0   :  { %249 = vmatprep.subr.bf16.mxu0 %v1561_v53 }
 0x7c7   :  { %250 = vmatpush1.bf16.xpose.msra.mxu0 %v1559_v54 }
 0x7ce   :  { %280 = vmatmul.mubr.bf16.vlgmr.msra.gmra.mrb[0].mxu0 %v89_v55 }
 0x7cf   :  { %1464 = vmatprep.mubr.msk.f32.mxu0 %vm1677_vm1, %v1676_v41 }
 0x87f   :  { %v1444_v9 = vpop.f32.mrb[12].mxu1 }
 0x880   :  { %v1349_v10 = vmul.f32 -1.702, %v1444_v9  ;;  %v972_v11 = vpop.f32.mrb[13].mxu1 }
 0x881   :  { %v1348_v12 = vmul.f32 -1.702, %v972_v11 }
 0x882   :  { %v987_v13 = vmul.f32 1.442695, %v1349_v10  ;;  %v306_v10 = vld [vmem:[#allocation2 + $0x58] sm:$0xff] }
 0x883   :  { %v985_v14 = vmul.f32 1.442695, %v1348_v12 }
 0x884   :  { %1578 = vpow2.f32 %v987_v13  ;;  %v310_v13 = vld [vmem:[#allocation2 + $0x78] sm:$0xff] }
 0x885   :  { %1580 = vpow2.f32 %v985_v14  ;;  %v1508_v14 = vpack.c.bf16 %v310_v13, %v306_v10 }
 0x88e   :  { %v1579_v15 = vpop.eup %1578 }
 0x88f   :  { %v1581_v16 = vpop.eup %1580  ;;  %v990_v17 = vadd.f32 1.0, %v1579_v15  ;;  %v105_v15 = vsub.s32 6, %v1758_v26 }
 0x890   :  { %v989_v18 = vadd.f32 1.0, %v1581_v16 }
 0x891   :  { %1582 = vrcp.f32 %v990_v17 }
 0x892   :  { %1584 = vrcp.f32 %v989_v18  ;;  %v106_v18 = vrot.slane %v1761_v29, %v105_v15 }
 0x89b   :  { %v1583_v19 = vpop.eup %1582 }
 0x89c   :  { %v1585_v20 = vpop.eup %1584  ;;  %v996_v22 = vmul.f32 %v1583_v19, %v1444_v9  ;;  %v302_v9 = vld [vmem:[#allocation2 + $0x38] sm:$0xff] }
 0x89d   :  { %v995_v21 = vmul.f32 %v1585_v20, %v972_v11  ;;  %v1681_v11 = vmov 0.0|0.0  }
 0x89e   :  { %1504 = vmatprep.subr.bf16.mxu0 %v1681_v11 }
 0x89f   :  { %1453 = vmatprep.mubr.f32.mxu1 %v995_v21 }
 0x8a0   :  { %1454 = vmatmul.mubr.f32.vlgmr.msra.gmra.mrb[14].mxu1 %v996_v22 }
 0x8a1   :  { %v281_v16 = vpop.f32.mrb[0].mxu0 }
 0x8a2   :  { %v283_v17 = vpop.f32.mrb[1].mxu0  ;;  %v1510_v21 = vadd.f32 %v281_v16, %v106_v18 }
 0x8a3   :  { %v284_v19 = vpop.f32.mrb[2].mxu0 }
 0x8a4   :  { %v285_v20 = vpop.f32.mrb[3].mxu0  ;;  %v287_v22 = vmul.f32 %v1510_v21, %v1510_v21 }
 0x8a6   :  { %v289_v23 = vsel %vm288_vm3, %v287_v22, 0.0 }
 0x973   :  { %v1455_v56 = vpop.f32.mrb[14].mxu1 }
 0x974   :  { %v1073_v57 = vadd.f32 %v1455_v56, %v1799_v25  ;;  %v1063_v58 = vpop.f32.mrb[15].mxu1 }
 0x975   :  { %v1072_v59 = vadd.f32 %v1063_v58, %v1802_v28  ;;  %v298_v28 = vld [vmem:[#allocation2 + $0x18] sm:$0xff] }
 0x976   :  { %v1077_v60 = vsel %vm311_vm0, %v1073_v57, 0.0  ;;  %v1505_v12 = vpack.c.bf16 %v302_v9, %v298_v28 }
 0x977   :  { %1078 = vadd.xlane.f32.xlu1 %v1077_v60  ;;  %v1074_v61 = vsel %vm311_vm0, %v1072_v59, 0.0 }
 0x978   :  { %1075 = vadd.xlane.f32.xlu0 %v1074_v61  ;;  %1506 = vmatpush3.bf16.msra.mxu0 %v1505_v12 }
 0x979   :  { %1507 = vmatprep.subr.bf16.mxu0 %v1681_v11 }
 0x97c   :  { %1509 = vmatpush3.bf16.msra.mxu0 %v1508_v14 }
 0x97d   :  { %1467 = vmatprep.subr.mxu0 %v1676_v41 }
 0xa04   :  { %v1079_v62 = vpop.xlane.xlu1 %1078 }
 0xa05   :  { %v1081_v63 = vmul.f32 0.03125, %v1079_v62  ;;  %v1076_v2 = vpop.xlane.xlu0 %1075 }
 0xa06   :  { %v1080_v3 = vmul.f32 0.03125, %v1076_v2 }
 0xa07   :  { %v1083_v4 = vsub.f32 %v1073_v57, %v1081_v63 }
 0xa08   :  { %v1082_v5 = vsub.f32 %v1072_v59, %v1080_v3 }
 0xa09   :  { %v1085_v6 = vmul.f32 %v1083_v4, %v1083_v4 }
 0xa0a   :  { %v1084_v7 = vmul.f32 %v1082_v5, %v1082_v5 }
 0xa0b   :  { %v1089_v8 = vsel %vm311_vm0, %v1085_v6, 0.0 }
 0xa0c   :  { %1090 = vadd.xlane.f32.xlu1 %v1089_v8  ;;  %v1086_v25 = vsel %vm311_vm0, %v1084_v7, 0.0 }
 0xa0d   :  { %1087 = vadd.xlane.f32.xlu0 %v1086_v25 }
 0xa10   :  { %290 = vadd.xlane.f32.xlu1 %v289_v23 }
 0xa99   :  { %v1091_v24 = vpop.xlane.xlu1 %1090 }
 0xa9a   :  { %v1093_v27 = vmul.f32 0.03125, %v1091_v24  ;;  %v1088_v30 = vpop.xlane.xlu0 %1087 }
 0xa9b   :  { %v1092_v31 = vmul.f32 0.03125, %v1088_v30 }
 0xa9c   :  { %v1095_v32 = vadd.f32 1e-05, %v1093_v27 }
 0xa9d   :  { %v1094_v33 = vadd.f32 1e-05, %v1092_v31  ;;  %v291_v29 = vpop.xlane.xlu1 %290 }
 0xa9e   :  { %1586 = vrsqrt.f32 %v1095_v32  ;;  %v292_v51 = vadd.f32 1e-12, %v291_v29 }
 0xa9f   :  { %1588 = vrsqrt.f32 %v1094_v33 }
 0xaa8   :  { %v1587_v1 = vpop.eup %1586 }
 0xaa9   :  { %v1589_v37 = vpop.eup %1588  ;;  %v1099_v0 = vmul.f32 %v1587_v1, %v1083_v4 }
 0xaaa   :  { %v1098_v39 = vmul.f32 %v1589_v37, %v1082_v5 }
 0xaab   :  { %v1105_v40 = vmul.f32 %v1103_v36, %v1099_v0 }
 0xaac   :  { %v1104_v42 = vmul.f32 %v1103_v36, %v1098_v39 }
 0xaad   :  { %v1111_v43 = vadd.f32 %v1109_v38, %v1105_v40 }
 0xaae   :  { %v1110_v44 = vadd.f32 %v1109_v38, %v1104_v42 }
 0xaaf   :  { %v1116_v45 = vrot.slane %v1111_v43, 5 }
 0xab0   :  { %v1113_v46 = vrot.slane %v1110_v44, 6 }
 0xab2   :  { %v1119_v47 = vsel %vm1118_vm4, %v1113_v46, %v1116_v45 }
 0xab3   :  { %1465 = vmatmul.mubr.msk.f32.vlgmr.msra.gmra.mrb[4].mxu0 %vm311_vm0, %v1119_v47 }
 0xab4   :  { %1469 = vmatprep.mubr.msk.f32.mxu0 %vm1677_vm1, %v1676_v41 }
 0xb86   :  { %v1189_v26 = vpop.f32.mrb[4].mxu0 }
 0xb87   :  { %v1193_v48 = vmul.f32 %v1189_v26, %v1189_v26  ;;  %v1466_v49 = vpop.f32.mrb[5].mxu0 }
 0xb89   :  { %v1194_v50 = vsel %vm288_vm3, %v1193_v48, 0.0 }
 0xb8a   :  { %1195 = vadd.xlane.f32.xlu0 %v1194_v50 }
 0xc17   :  { %v1196_v52 = vpop.xlane.xlu0 %1195 }
 0xc18   :  { %v1197_v53 = vadd.f32 1e-12, %v1196_v52 }
 0xc1a   :  { %1590 = vrsqrt.f32 %v1197_v53 }
 0xc1b   :  { %1592 = vrsqrt.f32 %v292_v51 }
 0xc24   :  { %v1591_v54 = vpop.eup %1590 }
 0xc25   :  { %v1593_v55 = vpop.eup %1592  ;;  %v1199_v56 = vmul.f32 %v1591_v54, %v1189_v26 }
 0xc26   :  { %v294_v57 = vmul.f32 %v1593_v55, %v1510_v21 }
 0xc27   :  { %1468 = vmatpush3.xpose.msk.msra.mxu0 %vm311_vm0, %v1199_v56 }
 0xc2a   :  { %1470 = vmatmul.mubr.msk.f32.vlgmr.msra.gmra.mrb[6].mxu0 %vm311_vm0, %v294_v57 }
 0xcfd   :  { %v1272_v41 = vpop.f32.mrb[6].mxu0 }
 0xcfe   :  { %v1276_v58 = vmul.f32 100.0, %v1272_v41  ;;  %v1471_v59 = vpop.f32.mrb[7].mxu0 }
 0xd00   :  { %v1278_v60 = vsel %vm1277_vm5, %v1276_v58, -inf }
 0xd01   :  { %1279 = vmax.xlane.f32.xlu0 %v1278_v60 }
 0xd8e   :  { %v1280_v61 = vpop.xlane.xlu0 %1279 }
 0xd8f   :  { %v1281_v62 = vsub.f32 %v1276_v58, %v1280_v61 }
 0xd91   :  { %v1282_v63 = vmul.f32 1.442695, %v1281_v62 }
 0xd93   :  { %1594 = vpow2.f32 %v1282_v63 }
 0xd9d   :  { %v1595_v2 = vpop.eup %1594 }
 0xd9e   :  { %v1284_v3 = vsel %vm1277_vm5, %v1595_v2, 0.0 }
 0xd9f   :  { %1285 = vadd.xlane.f32.xlu1 %v1284_v3 }
 0xe2c   :  { %v1286_v4 = vpop.xlane.xlu1 %1285 }
 0xe2d   :  { %1596 = vlog2.f32 %v1286_v4 }
 0xe37   :  { %v1597_v5 = vpop.eup %1596 }
 0xe38   :  { %v1288_v6 = vmul.f32 0.6931472, %v1597_v5 }
 0xe3a   :  { %v1289_v7 = vadd.f32 %v1288_v6, %v1280_v61 }
 0xe3c   :  { %v1290_v8 = vsub.f32 %v1289_v7, %v1276_v58 }
 0xe3e   :  { %v1292_v25 = vsel %vm1291_vm6, %v1290_v8, 0.0 }
 0xe3f   :  { %v1293_v28 = vrot.slane %v1292_v25, 4 }
 0xe41   :  { %v1294_v9 = vadd.f32 %v1293_v28, %v1292_v25 }
 0xe43   :  { %v1295_v10 = vrot.slane %v1294_v9, 2 }
 0xe45   :  { %v1296_v11 = vadd.f32 %v1295_v10, %v1294_v9 }
 0xe47   :  { %v1297_v12 = vrot.slane %v1296_v11, 1 }
 0xe49   :  { %v1298_v13 = vadd.f32 %v1297_v12, %v1296_v11 }
 0xe4b   :  { %v1300_v14 = vmul.f32 0.5, %v1298_v13 }
 0xe4d   :  { %1302 = vrot.lane.b32.xlu0 %v1300_v14, %s1682_s0 }
 0xebf   :  { %v1303_v15 = vpop.permute.xlu0 %1302 }
 0xec0   :  { %1306 = vst.msk [vmem:[#allocation7] sm:$0x1] %vm1305_vm7, %v1303_v15 }
 0xec1   :  { %1653 = shalt.err (!%p1650_p6)
}
 0xec2   :  { %s1654_s22 = scalar_lea.hbm %s1899_s4, 16 }
 0xec3   :  { %p1655_p7 = scmp.ne.s32.totalorder %s1899_s4, %s1654_s22  ;;  %p1658_p8 = scmp.lt.u32.totalorder %s1654_s22, %s1899_s4 }
 0xec5   :  { %p1660_p9 = pnand %p1658_p8, %p1655_p7 }
 0xec7   :  { %1663 = shalt.err (!%p1660_p9)
}
 0xec8   :  { %1316 = dma.vmem_to_hbm [thread:$0]  %s1314_s17, 16, %s1899_s4, [#allocation4]  }
 0xec9   :  { %1668 = dma.done.wait [#allocation4], 16  }
 0xeca   :  { %1669 = vsyncadd [#allocation4], 4294967280 }
 0xecb   :  { %1320 = vsyncpa [#allocation3], 1 }
 0xecc   :  { %1321 = vsyncpa [#allocation6], 1 }
 0xecd   :  { %1322 = vsyncpa [#allocation4], 1 }

</bundles_post_ra>
